<compile_context>
chip_gen: v7x
topology: tpu7x:2x2x1
jax: 0.10.0
libtpu: 0.0.40
codegen_flags: <defaults>
</compile_context>

<pallas_src>
import math

import jax
import jax.numpy as jnp
from jax.experimental import pallas as pl
from jax.experimental.pallas import tpu as pltpu


def _round_up(x, m):
    return (x + m - 1) // m * m


# -----------------------------------------------------------------------------
# Generation-aware tuning
# -----------------------------------------------------------------------------
def _tpu_tuning():
    """Row tile + VMEM budget per TPU generation."""
    mib = 1024 * 1024
    try:
        kind = jax.devices()[0].device_kind.lower()
    except Exception:  # pragma: no cover
        kind = ""
    try:
        vmem_cap = int(pltpu.get_tpu_info().vmem_capacity_bytes)
        if vmem_cap <= 0:
            vmem_cap = 64 * mib
    except Exception:  # pragma: no cover
        vmem_cap = 64 * mib  # conservative default (v7x per-TC)

    if "v5 lite" in kind or "v5e" in kind:
        # 4x128x128 MXU; 128 MiB VMEM is otherwise under-used -> large budget.
        row_tile, vmem_limit = 128, 100 * mib
    elif "v7" in kind:
        # 64 MiB VMEM per TC; "parallel" axis duplicates residents per TC.
        row_tile, vmem_limit = 256, 40 * mib
    else:
        # v6e and default: 2x256x256 MXU, 128 MiB VMEM.
        row_tile, vmem_limit = 256, 64 * mib

    vmem_limit = min(vmem_limit, int(0.8 * vmem_cap))
    return row_tile, vmem_limit


# -----------------------------------------------------------------------------
# Fused single-call kernel (small graphs: adj fully VMEM-resident)
#   out = adj @ (relu(adj @ W1 + b1) @ W2) + b2
# -----------------------------------------------------------------------------
def _gcn_fused_kernel(adj_ref, w1_ref, b1_ref, w2_ref, b2_ref, o_ref):
    adj = adj_ref[...]                                         # (Vp, Vp) bf16
    h = jnp.dot(adj, w1_ref[...], preferred_element_type=jnp.float32)
    h = jnp.maximum(h + b1_ref[...], 0.0)                      # f32 bias + ReLU
    # TODO(synk): training-mode dropout (pltpu.prng_random_bits mask + 1/(1-p)
    #             scale) not emitted; nn.Dropout in eval mode is the identity.
    s2 = jnp.dot(h.astype(jnp.bfloat16), w2_ref[...],
                 preferred_element_type=jnp.float32)
    out = jnp.dot(adj, s2.astype(jnp.bfloat16),
                  preferred_element_type=jnp.float32)
    o_ref[...] = out + b2_ref[...]


def _gcn_fused_call(adj_p, w1_p, b1_p, w2_p, b2_p, *, vp, ep, vmem_limit):
    cparams = pltpu.CompilerParams(
        dimension_semantics=("arbitrary",),
        vmem_limit_bytes=vmem_limit,
    )
    return pl.pallas_call(
        _gcn_fused_kernel,
        out_shape=jax.ShapeDtypeStruct((vp, ep), jnp.float32),
        grid=(1,),
        in_specs=[
            pl.BlockSpec((vp, vp), lambda i: (0, 0)),   # adj (resident)
            pl.BlockSpec((vp, ep), lambda i: (0, 0)),   # W1
            pl.BlockSpec((1, ep), lambda i: (0, 0)),    # b1
            pl.BlockSpec((ep, ep), lambda i: (0, 0)),   # W2
            pl.BlockSpec((1, ep), lambda i: (0, 0)),    # b2
        ],
        out_specs=pl.BlockSpec((vp, ep), lambda i: (0, 0)),
        compiler_params=cparams,
    )(adj_p, w1_p, b1_p, w2_p, b2_p)


# -----------------------------------------------------------------------------
# Large-graph path: two row-tiled, K-tiled streaming passes
#   Pass 1: S2[rows] = relu(adj[rows,:] @ W1 + b1) @ W2
#   Pass 2: out[rows] = adj[rows,:] @ S2 + b2
# K (the contraction over Vp) is the innermost, "arbitrary" grid axis with an
# f32 VMEM accumulator -> VMEM footprint independent of V.
# -----------------------------------------------------------------------------
def _gcn_pass1_kernel(adj_ref, w1_ref, b1_ref, w2_ref, s2_ref, acc_ref):
    k = pl.program_id(1)

    @pl.when(k == 0)
    def _():
        acc_ref[...] = jnp.zeros_like(acc_ref)

    acc_ref[...] += jnp.dot(adj_ref[...], w1_ref[...],
                            preferred_element_type=jnp.float32)

    @pl.when(k == pl.num_programs(1) - 1)
    def _():
        h = jnp.maximum(acc_ref[...] + b1_ref[...], 0.0)   # bias + ReLU, once per row tile
        # TODO(synk): eval-mode dropout is identity (see fused kernel).
        s2 = jnp.dot(h.astype(jnp.bfloat16), w2_ref[...],
                     preferred_element_type=jnp.float32)
        s2_ref[...] = s2.astype(s2_ref.dtype)


def _gcn_pass2_kernel(adj_ref, s2_ref, b2_ref, o_ref, acc_ref):
    k = pl.program_id(1)

    @pl.when(k == 0)
    def _():
        acc_ref[...] = jnp.zeros_like(acc_ref)

    acc_ref[...] += jnp.dot(adj_ref[...], s2_ref[...],
                            preferred_element_type=jnp.float32)

    @pl.when(k == pl.num_programs(1) - 1)
    def _():
        o_ref[...] = acc_ref[...] + b2_ref[...]             # bias added once


def _gcn_two_pass_call(adj_p, w1_p, b1_p, w2_p, b2_p, *,
                       vp, ep, row_tile, k_tile, vmem_limit):
    grid = (vp // row_tile, vp // k_tile)
    cparams = pltpu.CompilerParams(
        dimension_semantics=("parallel", "arbitrary"),   # rows across TCs, K serial
        vmem_limit_bytes=vmem_limit,
    )

    # Pass 1: W1 is K-streamed alongside adj (extra HBM traffic ~ ep/row_tile of the
    # adj stream); W2 / b1 are tiny (<= ep*ep bf16 = 32 KiB) residents.
    s2 = pl.pallas_call(
        _gcn_pass1_kernel,
        out_shape=jax.ShapeDtypeStruct((vp, ep), jnp.bfloat16),
        grid=grid,
        in_specs=[
            pl.BlockSpec((row_tile, k_tile), lambda i, k: (i, k)),  # adj tile
            pl.BlockSpec((k_tile, ep), lambda i, k: (k, 0)),        # W1 (K-streamed)
            pl.BlockSpec((1, ep), lambda i, k: (0, 0)),             # b1
            pl.BlockSpec((ep, ep), lambda i, k: (0, 0)),            # W2
        ],
        out_specs=pl.BlockSpec((row_tile, ep), lambda i, k: (i, 0)),
        scratch_shapes=[pltpu.VMEM((row_tile, ep), jnp.float32)],
        compiler_params=cparams,
    )(adj_p, w1_p, b1_p, w2_p)

    # Pass 2: S2 is K-streamed; only the small V x ep S2 (bf16) touches HBM between passes.
    out_p = pl.pallas_call(
        _gcn_pass2_kernel,
        out_shape=jax.ShapeDtypeStruct((vp, ep), jnp.float32),
        grid=grid,
        in_specs=[
            pl.BlockSpec((row_tile, k_tile), lambda i, k: (i, k)),  # adj tile
            pl.BlockSpec((k_tile, ep), lambda i, k: (k, 0)),        # S2 (K-streamed)
            pl.BlockSpec((1, ep), lambda i, k: (0, 0)),             # b2
        ],
        out_specs=pl.BlockSpec((row_tile, ep), lambda i, k: (i, 0)),
        scratch_shapes=[pltpu.VMEM((row_tile, ep), jnp.float32)],
        compiler_params=cparams,
    )(adj_p, s2, b2_p)
    return out_p


# -----------------------------------------------------------------------------
# Model construction (one-time pad/cast, hoisted out of the jitted forward)
# -----------------------------------------------------------------------------
def make_gcn_forward(adj_norm, w1, b1, w2, b2, *, fused_max_v=2048, k_tile=512):
    """Build the GCN forward (eval mode).

    adj_norm: (V, V) already row-normalized adjacency (as in GCN.__init__).
    Assumes the feature matrix is the identity (x = eye(V)), so x @ W1 == W1.
    Returns a zero-argument callable matching GCN.forward().
    """
    V = adj_norm.shape[0]
    E = w2.shape[1]
    row_tile, vmem_limit = _tpu_tuning()

    # 128 lanes already gives unmasked vst on all generations.
    ep = _round_up(max(E, 128), 128)

    fused = V <= fused_max_v
    if fused:
        vp = _round_up(max(V, 128), 128)
    else:
        tile = (k_tile * row_tile) // math.gcd(k_tile, row_tile)
        vp = _round_up(max(V, tile), tile)

    # One-time padding + bf16 cast (hoisted; NOT repeated per forward call).
    # Padding happens AFTER normalization: padded adj columns are exactly zero,
    # which is what makes the nonzero padded rows of h/S2 (relu(b1), relu(b1)@W2)
    # harmless for the real output rows.
    adj_p = jnp.pad(jnp.asarray(adj_norm, jnp.float32),
                    ((0, vp - V), (0, vp - V))).astype(jnp.bfloat16)
    w1_p = jnp.pad(jnp.asarray(w1, jnp.float32),
                   ((0, vp - V), (0, ep - E))).astype(jnp.bfloat16)
    w2_p = jnp.pad(jnp.asarray(w2, jnp.float32),
                   ((0, ep - E), (0, ep - E))).astype(jnp.bfloat16)
    b1_p = jnp.pad(jnp.asarray(b1, jnp.float32).reshape(1, -1),
                   ((0, 0), (0, ep - E)))
    b2_p = jnp.pad(jnp.asarray(b2, jnp.float32).reshape(1, -1),
                   ((0, 0), (0, ep - E)))

    if fused:
        def _fwd(a, x1, y1, x2, y2):
            out_p = _gcn_fused_call(a, x1, y1, x2, y2,
                                    vp=vp, ep=ep, vmem_limit=vmem_limit)
            return out_p[:V, :E]
    else:
        def _fwd(a, x1, y1, x2, y2):
            out_p = _gcn_two_pass_call(a, x1, y1, x2, y2,
                                       vp=vp, ep=ep, row_tile=row_tile,
                                       k_tile=k_tile, vmem_limit=vmem_limit)
            return out_p[:V, :E]

    fwd = jax.jit(_fwd)

    def forward():
        return fwd(adj_p, w1_p, b1_p, w2_p, b2_p)

    return forward


# -----------------------------------------------------------------------------
# Reference-module helpers
# -----------------------------------------------------------------------------
def row_normalize(mx):
    """Row-normalize matrix (matches GCN.normalize)."""
    rowsum = mx.sum(axis=1)
    r_inv = jnp.where(rowsum == 0.0, 0.0, 1.0 / rowsum)
    return r_inv[:, None] * mx


def init_graph_conv_params(key, in_features, out_features):
    """Mimic GraphConvolution.reset_parameters(): U(-stdv, stdv), stdv = 1/sqrt(out)."""
    stdv = 1.0 / math.sqrt(out_features)
    k_w, k_b = jax.random.split(key)
    w = jax.random.uniform(k_w, (in_features, out_features), jnp.float32, -stdv, stdv)
    b = jax.random.uniform(k_b, (1, out_features), jnp.float32, -stdv, stdv)
    return w, b


if __name__ == "__main__":
    def run_case(voc_size, emb_dim, fused_max_v, key):
        k_adj, k_g1, k_g2 = jax.random.split(key, 3)

        # Synthetic symmetric binary adjacency matrix.
        raw = jax.random.uniform(k_adj, (voc_size, voc_size))
        adj_raw = (raw + raw.T > 1.2).astype(jnp.float32)

        # GCN.__init__ preprocessing: adj = normalize(adj + I); x = eye(V) folded away.
        adj = row_normalize(adj_raw + jnp.eye(voc_size, dtype=jnp.float32))

        w1, b1 = init_graph_conv_params(k_g1, voc_size, emb_dim)
        w2, b2 = init_graph_conv_params(k_g2, emb_dim, emb_dim)

        forward = make_gcn_forward(adj, w1, b1, w2, b2, fused_max_v=fused_max_v)
        out = forward()
        jax.block_until_ready(out)

        # Plain-JAX f32 reference (x = eye  =>  x @ W1 == W1).
        h_ref = jnp.maximum(adj @ w1 + b1, 0.0)
        out_ref = adj @ (h_ref @ w2) + b2

        assert out.shape == (voc_size, emb_dim)
        max_err = float(jnp.max(jnp.abs(out - out_ref)))
        assert jnp.allclose(out, out_ref, atol=3e-2, rtol=3e-2), max_err
        return max_err

    key = jax.random.PRNGKey(0)
    k1, k2 = jax.random.split(key)

    # Small graph (the module's toy shape): fused single-call, adj VMEM-resident.
    run_case(32, 32, fused_max_v=2048, key=k1)
    # Larger graph with fusion disabled: exercises the streaming two-pass,
    # K-tiled accumulator path (grid rows x K > 1).
    run_case(1200, 32, fused_max_v=0, key=k2)

    print("KERNEL_OK")
</pallas_src>

<mosaic_0001>
module attributes {stable_mosaic.version = 11 : i64} {
  func.func @_gcn_fused_kernel(%arg0: i32, %arg1: memref<128x128xbf16, #tpu.memory_space<vmem>>, %arg2: memref<128x128xbf16, #tpu.memory_space<vmem>>, %arg3: memref<1x128xf32, #tpu.memory_space<vmem>>, %arg4: memref<128x128xbf16, #tpu.memory_space<vmem>>, %arg5: memref<1x128xf32, #tpu.memory_space<vmem>>, %arg6: memref<128x128xf32, #tpu.memory_space<vmem>>) attributes {dimension_semantics = [#tpu.dimension_semantics<arbitrary>], iteration_bounds = array<i64: 1>, scalar_prefetch = 0 : i64, scratch_operands = 0 : i64, tpu.core_type = #tpu.core_type<tc>, window_params = [{pipeline_mode = #tpu.pipeline_mode<synchronous>, transform_indices = @transform_0, window_bounds = array<i64: 128, 128>}, {pipeline_mode = #tpu.pipeline_mode<synchronous>, transform_indices = @transform_1, window_bounds = array<i64: 128, 128>}, {pipeline_mode = #tpu.pipeline_mode<synchronous>, transform_indices = @transform_2, window_bounds = array<i64: 1, 128>}, {pipeline_mode = #tpu.pipeline_mode<synchronous>, transform_indices = @transform_3, window_bounds = array<i64: 128, 128>}, {pipeline_mode = #tpu.pipeline_mode<synchronous>, transform_indices = @transform_4, window_bounds = array<i64: 1, 128>}, {pipeline_mode = #tpu.pipeline_mode<synchronous>, transform_indices = @transform_5, window_bounds = array<i64: 128, 128>}]} {
    %c0 = arith.constant 0 : index
    %c0_0 = arith.constant 0 : index
    %0 = vector.load %arg1[%c0, %c0_0] : memref<128x128xbf16, #tpu.memory_space<vmem>>, vector<128x128xbf16>
    %c0_1 = arith.constant 0 : index
    %c0_2 = arith.constant 0 : index
    %1 = vector.load %arg2[%c0_1, %c0_2] : memref<128x128xbf16, #tpu.memory_space<vmem>>, vector<128x128xbf16>
    %cst = arith.constant dense<0.000000e+00> : vector<128x128xf32>
    %2 = tpu.matmul %0, %1, %cst {dimension_numbers = #tpu.dot_dimension_numbers<[1], [0], [0], [1], [0, 0, 1, 1], [], []>} : vector<128x128xbf16>, vector<128x128xbf16>, vector<128x128xf32> -> vector<128x128xf32>
    %c0_3 = arith.constant 0 : index
    %c0_4 = arith.constant 0 : index
    %3 = vector.load %arg3[%c0_3, %c0_4] : memref<1x128xf32, #tpu.memory_space<vmem>>, vector<1x128xf32>
    %4 = vector.broadcast %3 : vector<1x128xf32> to vector<128x128xf32>
    %5 = arith.addf %2, %4 : vector<128x128xf32>
    %cst_5 = arith.constant 0.000000e+00 : f32
    %6 = vector.broadcast %cst_5 : f32 to vector<128x128xf32>
    %7 = arith.maximumf %5, %6 : vector<128x128xf32>
    %8 = arith.truncf %7 : vector<128x128xf32> to vector<128x128xbf16>
    %c0_6 = arith.constant 0 : index
    %c0_7 = arith.constant 0 : index
    %9 = vector.load %arg4[%c0_6, %c0_7] : memref<128x128xbf16, #tpu.memory_space<vmem>>, vector<128x128xbf16>
    %cst_8 = arith.constant dense<0.000000e+00> : vector<128x128xf32>
    %10 = tpu.matmul %8, %9, %cst_8 {dimension_numbers = #tpu.dot_dimension_numbers<[1], [0], [0], [1], [0, 0, 1, 1], [], []>} : vector<128x128xbf16>, vector<128x128xbf16>, vector<128x128xf32> -> vector<128x128xf32>
    %11 = arith.truncf %10 : vector<128x128xf32> to vector<128x128xbf16>
    %cst_9 = arith.constant dense<0.000000e+00> : vector<128x128xf32>
    %12 = tpu.matmul %0, %11, %cst_9 {dimension_numbers = #tpu.dot_dimension_numbers<[1], [0], [0], [1], [0, 0, 1, 1], [], []>} : vector<128x128xbf16>, vector<128x128xbf16>, vector<128x128xf32> -> vector<128x128xf32>
    %c0_10 = arith.constant 0 : index
    %c0_11 = arith.constant 0 : index
    %13 = vector.load %arg5[%c0_10, %c0_11] : memref<1x128xf32, #tpu.memory_space<vmem>>, vector<1x128xf32>
    %14 = vector.broadcast %13 : vector<1x128xf32> to vector<128x128xf32>
    %15 = arith.addf %12, %14 : vector<128x128xf32>
    %c0_12 = arith.constant 0 : index
    %c0_13 = arith.constant 0 : index
    %16 = vector.load %arg6[%c0_12, %c0_13] : memref<128x128xf32, #tpu.memory_space<vmem>>, vector<128x128xf32>
    tpu.vector_store %arg6[%c0_12, %c0_13], %15 {strides = array<i32>} : memref<128x128xf32, #tpu.memory_space<vmem>>, vector<128x128xf32>,
    return
  }
  func.func @transform_0(%arg0: i32) -> (i32, i32) {
    %c0_i32 = arith.constant 0 : i32
    %c0_i32_0 = arith.constant 0 : i32
    %c0_i32_1 = arith.constant 0 : i32
    return %c0_i32, %c0_i32_0 : i32, i32
  }
  func.func @transform_1(%arg0: i32) -> (i32, i32) {
    %c0_i32 = arith.constant 0 : i32
    %c0_i32_0 = arith.constant 0 : i32
    %c0_i32_1 = arith.constant 0 : i32
    return %c0_i32, %c0_i32_0 : i32, i32
  }
  func.func @transform_2(%arg0: i32) -> (i32, i32) {
    %c0_i32 = arith.constant 0 : i32
    %c0_i32_0 = arith.constant 0 : i32
    %c0_i32_1 = arith.constant 0 : i32
    return %c0_i32, %c0_i32_0 : i32, i32
  }
  func.func @transform_3(%arg0: i32) -> (i32, i32) {
    %c0_i32 = arith.constant 0 : i32
    %c0_i32_0 = arith.constant 0 : i32
    %c0_i32_1 = arith.constant 0 : i32
    return %c0_i32, %c0_i32_0 : i32, i32
  }
  func.func @transform_4(%arg0: i32) -> (i32, i32) {
    %c0_i32 = arith.constant 0 : i32
    %c0_i32_0 = arith.constant 0 : i32
    %c0_i32_1 = arith.constant 0 : i32
    return %c0_i32, %c0_i32_0 : i32, i32
  }
  func.func @transform_5(%arg0: i32) -> (i32, i32) {
    %c0_i32 = arith.constant 0 : i32
    %c0_i32_0 = arith.constant 0 : i32
    %c0_i32_1 = arith.constant 0 : i32
    return %c0_i32, %c0_i32_0 : i32, i32
  }
}

</mosaic_0001>

<bundles_post_ra>
// kernel: _fwd.1
= control target key start
LH: loop header
LB: loop body
LE: loop exit
PB: predicated region body
PF: predicated region fallthrough
CT: control target
= control target key end

     0   :  { %10 = vsyncpa [#allocation3], 0  ;;  %s1067_s0 = inlined_call_operand.hbm [shape: bf16[128,128], index: 0, kind: input, shape index: {}]   ;;  %s1068_s1 = inlined_call_operand.hbm [shape: bf16[128,128], index: 1, kind: input, shape index: {}]   ;;  %s1069_s2 = inlined_call_operand.vmem [shape: f32[1,128], index: 2, kind: input, shape index: {}]   ;;  %s1070_s3 = inlined_call_operand.hbm [shape: bf16[128,128], index: 3, kind: input, shape index: {}]   ;;  %s1071_s4 = inlined_call_operand.vmem [shape: f32[1,128], index: 4, kind: input, shape index: {}]   ;;  %s1072_s5 = inlined_call_operand.vmem [shape: f32[128,128], index: 5, kind: output, shape index: {}]  }
   0x1   :  { %11 = vsyncpa [#allocation5], 0  ;;  %s898_s18 = smov [#allocation4]   ;;  %s899_s20 = smov [#allocation2]  }
   0x2   :  { %s29_s19 = sshll.u32 %s898_s18, 4  ;;  %s17_s21 = sshll.u32 %s899_s20, 4  ;;  %s30_s19 = int_to_ptr.vmem [resolvable:$true] %s29_s19  ;;  %s933_s21 = int_to_ptr.vmem [resolvable:$true] %s17_s21 }
   0x3   :  { %s828_s24 = scalar_lea.hbm %s1068_s1, 1024 }
   0x4   :  { %p829_p0 = scmp.ne.s32.totalorder %s1068_s1, %s828_s24  ;;  %p832_p1 = scmp.lt.u32.totalorder %s828_s24, %s1068_s1 }
   0x6   :  { %p834_p2 = pnand %p832_p1, %p829_p0 }
   0x8   :  { %837 = shalt.err (!%p834_p2)
}
   0x9   :  { %s838_s29 = scalar_lea.vmem %s30_s19, 1024  ;;  %p843_p4 = scmp.lt.s32.totalorder %s30_s19, %s30_s19 }
   0xa   :  { %p839_p3 = scmp.ne.s32.totalorder %s30_s19, %s838_s29  ;;  %p844_p5 = scmp.lt.s32.totalorder %s838_s29, %s838_s29 }
   0xc   :  { %p845_p6 = por %p844_p5, %p843_p4 }
   0xe   :  { %p846_p7 = pnand %p845_p6, %p839_p3 }
  0x10   :  { %849 = shalt.err (!%p846_p7)
}
  0x11   :  { %s900_s30 = smov 64   ;;  %s901_s6 = smov 4  }
  0x12   :  { %35 = dma.hbm_to_vmem [thread:$0]  %s1068_s1, 1024, %s30_s19, [#allocation5], %s900_s30, %s900_s30, %s901_s6  }
  0x13   :  { %s850_s11 = scalar_lea.hbm %s1067_s0, 1024 }
  0x14   :  { %p851_p8 = scmp.ne.s32.totalorder %s1067_s0, %s850_s11  ;;  %p854_p9 = scmp.lt.u32.totalorder %s850_s11, %s1067_s0 }
  0x16   :  { %p856_p10 = pnand %p854_p9, %p851_p8 }
  0x18   :  { %859 = shalt.err (!%p856_p10)
}
  0x19   :  { %s860_s16 = scalar_lea.vmem %s933_s21, 1024  ;;  %p865_p12 = scmp.lt.s32.totalorder %s933_s21, %s933_s21 }
  0x1a   :  { %p861_p11 = scmp.ne.s32.totalorder %s933_s21, %s860_s16  ;;  %p866_p13 = scmp.lt.s32.totalorder %s860_s16, %s860_s16 }
  0x1c   :  { %p867_p0 = por %p866_p13, %p865_p12 }
  0x1e   :  { %p868_p1 = pnand %p867_p0, %p861_p11 }
  0x20   :  { %871 = shalt.err (!%p868_p1)
}
  0x21   :  { %23 = dma.hbm_to_vmem [thread:$0]  %s1067_s0, 1024, %s933_s21, [#allocation3], %s900_s30, %s900_s30, %s901_s6  }
  0x22   :  { %s902_s18 = smov [#allocation6]   ;;  %s872_s23 = scalar_lea.hbm %s1070_s3, 1024 }
  0x23   :  { %s43_s19 = sshll.u32 %s902_s18, 4  ;;  %p873_p2 = scmp.ne.s32.totalorder %s1070_s3, %s872_s23  ;;  %s44_s19 = int_to_ptr.vmem [resolvable:$true] %s43_s19 }
  0x24   :  { %p876_p3 = scmp.lt.u32.totalorder %s872_s23, %s1070_s3 }
  0x26   :  { %p878_p4 = pnand %p876_p3, %p873_p2 }
  0x28   :  { %881 = shalt.err (!%p878_p4)
}
  0x29   :  { %s882_s28 = scalar_lea.vmem %s44_s19, 1024  ;;  %p887_p6 = scmp.lt.s32.totalorder %s44_s19, %s44_s19 }
  0x2a   :  { %p883_p5 = scmp.ne.s32.totalorder %s44_s19, %s882_s28  ;;  %p888_p7 = scmp.lt.s32.totalorder %s882_s28, %s882_s28 }
  0x2c   :  { %p889_p8 = por %p888_p7, %p887_p6 }
  0x2e   :  { %p890_p9 = pnand %p889_p8, %p883_p5 }
  0x30   :  { %893 = shalt.err (!%p890_p9)
}
  0x31   :  { %49 = dma.hbm_to_vmem [thread:$0]  %s1070_s3, 1024, %s44_s19, [#allocation5], %s900_s30, %s900_s30, %s901_s6  }
  0x32   :  { %894 = dma.done.wait [#allocation3], 1024  }
  0x33   :  { %895 = vsyncadd [#allocation3], 4294966272 }
  0x34   :  { %896 = dma.done.wait [#allocation5], 2048  }
  0x35   :  { %897 = vsyncadd [#allocation5], 4294965248  ;;  %v804_v0 = vld [vmem:[#allocation4] sm:$0xff]   ;;  %v805_v1 = vld [vmem:[#allocation4 + $0x8] sm:$0xff]  }
  0x36   :  { %687 = vmatprep.subr.bf16.mxu0 %v804_v0  ;;  %v806_v2 = vld [vmem:[#allocation4 + $0x10] sm:$0xff]   ;;  %v807_v3 = vld [vmem:[#allocation4 + $0x18] sm:$0xff]   ;;  %v812_v4 = vld [vmem:[#allocation2] sm:$0xff]  }
  0x37   :  { %688 = vmatpush3.bf16.msra.mxu0 %v804_v0  ;;  %703 = vmatprep.mubr.bf16.mxu0 %v812_v4  ;;  %v808_v5 = vld [vmem:[#allocation4 + $0x20] sm:$0xff]   ;;  %v809_v6 = vld [vmem:[#allocation4 + $0x28] sm:$0xff]   ;;  %v810_v9 = vld [vmem:[#allocation4 + $0x30] sm:$0xff]  }
  0x38   :  { %689 = vmatprep.subr.bf16.mxu0 %v805_v1  ;;  %v820_v7 = vld [vmem:[#allocation6] sm:$0xff]   ;;  %v821_v8 = vld [vmem:[#allocation6 + $0x8] sm:$0xff]   ;;  %v822_v10 = vld [vmem:[#allocation6 + $0x10] sm:$0xff]  }
  0x39   :  { %719 = vmatprep.subr.bf16.mxu1 %v820_v7  ;;  %v811_v11 = vld [vmem:[#allocation4 + $0x38] sm:$0xff]   ;;  %v824_v13 = vld [vmem:[#allocation6 + $0x20] sm:$0xff]   ;;  %v985_v14 = vld [vmem:[#allocation2 + $0x8] sm:$0xff]  }
  0x3a   :  { %720 = vmatpush3.bf16.msra.mxu1 %v820_v7  ;;  %v823_v12 = vld [vmem:[#allocation6 + $0x18] sm:$0xff]   ;;  %v987_v15 = vld [vmem:[#allocation2 + $0x10] sm:$0xff]   ;;  %v825_v16 = vld [vmem:[#allocation6 + $0x28] sm:$0xff]  }
  0x3b   :  { %690 = vmatpush3.bf16.msra.mxu0 %v805_v1  ;;  %721 = vmatprep.subr.bf16.mxu1 %v821_v8  ;;  %v991_v17 = vld [vmem:[#allocation2 + $0x18] sm:$0xff]   ;;  %v993_v18 = vld [vmem:[#allocation2 + $0x20] sm:$0xff]   ;;  %v997_v19 = vld [vmem:[#allocation2 + $0x28] sm:$0xff]  }
  0x3c   :  { %691 = vmatprep.subr.bf16.mxu0 %v806_v2  ;;  %v999_v20 = vld [vmem:[#allocation2 + $0x30] sm:$0xff]   ;;  %v1003_v21 = vld [vmem:[#allocation2 + $0x38] sm:$0xff]   ;;  %v613_v24 = vld [vmem:[%s1069_s2] ss:$0 sm:$0xff] }
  0x3d   :  { %v826_v22 = vld [vmem:[#allocation6 + $0x30] sm:$0xff]   ;;  %v827_v23 = vld [vmem:[#allocation6 + $0x38] sm:$0xff]  }
  0x3e   :  { %722 = vmatpush3.bf16.msra.mxu1 %v821_v8 }
  0x3f   :  { %692 = vmatpush3.bf16.msra.mxu0 %v806_v2  ;;  %723 = vmatprep.subr.bf16.mxu1 %v822_v10 }
  0x40   :  { %693 = vmatprep.subr.bf16.mxu0 %v807_v3 }
  0x42   :  { %724 = vmatpush3.bf16.msra.mxu1 %v822_v10 }
  0x43   :  { %694 = vmatpush3.bf16.msra.mxu0 %v807_v3  ;;  %725 = vmatprep.subr.bf16.mxu1 %v823_v12 }
  0x44   :  { %695 = vmatprep.subr.bf16.mxu0 %v808_v5 }
  0x46   :  { %726 = vmatpush3.bf16.msra.mxu1 %v823_v12 }
  0x47   :  { %696 = vmatpush3.bf16.msra.mxu0 %v808_v5  ;;  %727 = vmatprep.subr.bf16.mxu1 %v824_v13 }
  0x48   :  { %697 = vmatprep.subr.bf16.mxu0 %v809_v6 }
  0x4a   :  { %728 = vmatpush3.bf16.msra.mxu1 %v824_v13 }
  0x4b   :  { %698 = vmatpush3.bf16.msra.mxu0 %v809_v6  ;;  %729 = vmatprep.subr.bf16.mxu1 %v825_v16 }
  0x4c   :  { %699 = vmatprep.subr.bf16.mxu0 %v810_v9 }
  0x4e   :  { %730 = vmatpush3.bf16.msra.mxu1 %v825_v16 }
  0x4f   :  { %700 = vmatpush3.bf16.msra.mxu0 %v810_v9  ;;  %731 = vmatprep.subr.bf16.mxu1 %v826_v22 }
  0x50   :  { %701 = vmatprep.subr.bf16.mxu0 %v811_v11 }
  0x52   :  { %732 = vmatpush3.bf16.msra.mxu1 %v826_v22 }
  0x53   :  { %702 = vmatpush3.bf16.msra.mxu0 %v811_v11  ;;  %733 = vmatprep.subr.bf16.mxu1 %v827_v23 }
  0x56   :  { %704 = vmatmul.mubr.bf16.vlgmr.msra.gmra.mrb[0].mxu0 %v985_v14  ;;  %734 = vmatpush3.bf16.msra.mxu1 %v827_v23 }
  0x57   :  { %707 = vmatprep.mubr.bf16.mxu0 %v987_v15 }
  0x5e   :  { %708 = vmatmul.mubr.bf16.gmra.mrb[4].mxu0 %v991_v17 }
  0x5f   :  { %711 = vmatprep.mubr.bf16.mxu0 %v993_v18 }
  0x66   :  { %712 = vmatmul.mubr.bf16.gmra.mrb[8].mxu0 %v997_v19 }
  0x67   :  { %715 = vmatprep.mubr.bf16.mxu0 %v999_v20 }
  0x6e   :  { %716 = vmatmul.mubr.bf16.gmra.mrb[12].mxu0 %v1003_v21 }
  0x6f   :  { %767 = vmatprep.mubr.bf16.mxu0 %v812_v4 }
 0x129   :  { %v705_v25 = vpop.f32.mrb[0].mxu0 }
 0x12a   :  { %v240_v26 = vadd.f32 %v705_v25, %v613_v24  ;;  %v231_v27 = vpop.f32.mrb[1].mxu0 }
 0x12b   :  { %v232_v28 = vadd.f32 %v613_v24, %v231_v27  ;;  %v706_v29 = vpop.f32.mrb[2].mxu0 }
 0x12c   :  { %v243_v30 = vadd.f32 %v706_v29, %v613_v24  ;;  %v234_v31 = vpop.f32.mrb[3].mxu0  ;;  %v296_v33 = vmax.f32 %v240_v26, 0.0 }
 0x12d   :  { %v235_v32 = vadd.f32 %v613_v24, %v234_v31  ;;  %v294_v35 = vmax.f32 %v232_v28, 0.0 }
 0x12e   :  { %v297_v34 = vmax.f32 %v243_v30, 0.0 }
 0x12f   :  { %v295_v36 = vmax.f32 %v235_v32, 0.0 }
 0x130   :  { %v311_v37 = vpack.c.bf16 %v297_v34, %v296_v33 }
 0x131   :  { %v709_v38 = vpop.f32.mrb[4].mxu0  ;;  %v310_v39 = vpack.c.bf16 %v295_v36, %v294_v35 }
 0x132   :  { %v256_v40 = vadd.f32 %v709_v38, %v613_v24  ;;  %v247_v41 = vpop.f32.mrb[5].mxu0 }
 0x133   :  { %v248_v42 = vadd.f32 %v613_v24, %v247_v41  ;;  %v710_v43 = vpop.f32.mrb[6].mxu0  ;;  %735 = vmatprep.mubr.bf16.mxu1 %v310_v39 }
 0x134   :  { %v259_v44 = vadd.f32 %v710_v43, %v613_v24  ;;  %v250_v45 = vpop.f32.mrb[7].mxu0  ;;  %736 = vmatmul.mubr.bf16.vlgmr.msra.gmra.mrb[0].mxu1 %v311_v37  ;;  %v300_v47 = vmax.f32 %v256_v40, 0.0 }
 0x135   :  { %v251_v46 = vadd.f32 %v613_v24, %v250_v45  ;;  %v298_v49 = vmax.f32 %v248_v42, 0.0 }
 0x136   :  { %v301_v48 = vmax.f32 %v259_v44, 0.0 }
 0x137   :  { %v299_v50 = vmax.f32 %v251_v46, 0.0 }
 0x138   :  { %v313_v51 = vpack.c.bf16 %v301_v48, %v300_v47  ;;  %v638_v47 = vld [vmem:[%s1071_s4] ss:$0 sm:$0xff] }
 0x139   :  { %v312_v52 = vpack.c.bf16 %v299_v50, %v298_v49  ;;  %v713_v53 = vpop.f32.mrb[8].mxu0 }
 0x13a   :  { %v272_v54 = vadd.f32 %v713_v53, %v613_v24  ;;  %v263_v55 = vpop.f32.mrb[9].mxu0 }
 0x13b   :  { %v264_v56 = vadd.f32 %v613_v24, %v263_v55  ;;  %v714_v57 = vpop.f32.mrb[10].mxu0  ;;  %739 = vmatprep.mubr.bf16.mxu1 %v312_v52 }
 0x13c   :  { %v275_v58 = vadd.f32 %v714_v57, %v613_v24  ;;  %v266_v59 = vpop.f32.mrb[11].mxu0  ;;  %740 = vmatmul.mubr.bf16.gmra.mrb[4].mxu1 %v313_v51  ;;  %v304_v61 = vmax.f32 %v272_v54, 0.0 }
 0x13d   :  { %v267_v60 = vadd.f32 %v613_v24, %v266_v59  ;;  %v302_v63 = vmax.f32 %v264_v56, 0.0 }
 0x13e   :  { %v305_v62 = vmax.f32 %v275_v58, 0.0 }
 0x13f   :  { %v303_v0 = vmax.f32 %v267_v60, 0.0 }
 0x140   :  { %v315_v1 = vpack.c.bf16 %v305_v62, %v304_v61 }
 0x141   :  { %v314_v2 = vpack.c.bf16 %v303_v0, %v302_v63  ;;  %v717_v3 = vpop.f32.mrb[12].mxu0 }
 0x142   :  { %v288_v4 = vadd.f32 %v717_v3, %v613_v24  ;;  %v279_v5 = vpop.f32.mrb[13].mxu0 }
 0x143   :  { %v280_v6 = vadd.f32 %v613_v24, %v279_v5  ;;  %v718_v7 = vpop.f32.mrb[14].mxu0  ;;  %743 = vmatprep.mubr.bf16.mxu1 %v314_v2 }
 0x144   :  { %v291_v8 = vadd.f32 %v718_v7, %v613_v24  ;;  %v282_v9 = vpop.f32.mrb[15].mxu0  ;;  %744 = vmatmul.mubr.bf16.gmra.mrb[8].mxu1 %v315_v1  ;;  %v308_v11 = vmax.f32 %v288_v4, 0.0 }
 0x145   :  { %v283_v10 = vadd.f32 %v613_v24, %v282_v9  ;;  %v306_v13 = vmax.f32 %v280_v6, 0.0 }
 0x146   :  { %v309_v12 = vmax.f32 %v291_v8, 0.0 }
 0x147   :  { %v307_v16 = vmax.f32 %v283_v10, 0.0 }
 0x148   :  { %v317_v22 = vpack.c.bf16 %v309_v12, %v308_v11 }
 0x149   :  { %v316_v23 = vpack.c.bf16 %v307_v16, %v306_v13 }
 0x14b   :  { %747 = vmatprep.mubr.bf16.mxu1 %v316_v23 }
 0x14c   :  { %748 = vmatmul.mubr.bf16.gmra.mrb[12].mxu1 %v317_v22 }
 0x14d   :  { %775 = vmatprep.mubr.bf16.mxu1 %v993_v18 }
 0x207   :  { %v737_v25 = vpop.f32.mrb[0].mxu1 }
 0x208   :  { %v416_v26 = vpop.f32.mrb[1].mxu1 }
 0x209   :  { %v738_v27 = vpop.f32.mrb[2].mxu1 }
 0x20a   :  { %v480_v28 = vpack.c.bf16 %v738_v27, %v737_v25  ;;  %v419_v29 = vpop.f32.mrb[3].mxu1 }
 0x20b   :  { %v479_v30 = vpack.c.bf16 %v419_v29, %v416_v26 }
 0x20d   :  { %751 = vmatprep.subr.bf16.mxu0 %v479_v30  ;;  %783 = vmatprep.subr.bf16.mxu1 %v479_v30 }
 0x20e   :  { %752 = vmatpush3.bf16.msra.mxu0 %v479_v30  ;;  %791 = vmatpush3.bf16.msra.mxu1 %v479_v30 }
 0x20f   :  { %v741_v24 = vpop.f32.mrb[4].mxu1  ;;  %753 = vmatprep.subr.bf16.mxu0 %v480_v28  ;;  %784 = vmatprep.subr.bf16.mxu1 %v480_v28 }
 0x210   :  { %v432_v31 = vpop.f32.mrb[5].mxu1 }
 0x211   :  { %v742_v32 = vpop.f32.mrb[6].mxu1 }
 0x212   :  { %v482_v33 = vpack.c.bf16 %v742_v32, %v741_v24  ;;  %v435_v34 = vpop.f32.mrb[7].mxu1  ;;  %754 = vmatpush3.bf16.msra.mxu0 %v480_v28  ;;  %792 = vmatpush3.bf16.msra.mxu1 %v480_v28 }
 0x213   :  { %v481_v18 = vpack.c.bf16 %v435_v34, %v432_v31 }
 0x215   :  { %755 = vmatprep.subr.bf16.mxu0 %v481_v18  ;;  %785 = vmatprep.subr.bf16.mxu1 %v481_v18 }
 0x216   :  { %756 = vmatpush3.bf16.msra.mxu0 %v481_v18  ;;  %793 = vmatpush3.bf16.msra.mxu1 %v481_v18 }
 0x217   :  { %v745_v35 = vpop.f32.mrb[8].mxu1  ;;  %757 = vmatprep.subr.bf16.mxu0 %v482_v33  ;;  %786 = vmatprep.subr.bf16.mxu1 %v482_v33 }
 0x218   :  { %v448_v36 = vpop.f32.mrb[9].mxu1 }
 0x219   :  { %v746_v37 = vpop.f32.mrb[10].mxu1 }
 0x21a   :  { %v484_v38 = vpack.c.bf16 %v746_v37, %v745_v35  ;;  %v451_v39 = vpop.f32.mrb[11].mxu1  ;;  %758 = vmatpush3.bf16.msra.mxu0 %v482_v33  ;;  %794 = vmatpush3.bf16.msra.mxu1 %v482_v33 }
 0x21b   :  { %v483_v40 = vpack.c.bf16 %v451_v39, %v448_v36 }
 0x21d   :  { %759 = vmatprep.subr.bf16.mxu0 %v483_v40  ;;  %787 = vmatprep.subr.bf16.mxu1 %v483_v40 }
 0x21e   :  { %760 = vmatpush3.bf16.msra.mxu0 %v483_v40  ;;  %795 = vmatpush3.bf16.msra.mxu1 %v483_v40 }
 0x21f   :  { %v749_v41 = vpop.f32.mrb[12].mxu1  ;;  %761 = vmatprep.subr.bf16.mxu0 %v484_v38  ;;  %788 = vmatprep.subr.bf16.mxu1 %v484_v38 }
 0x220   :  { %v464_v42 = vpop.f32.mrb[13].mxu1 }
 0x221   :  { %v750_v43 = vpop.f32.mrb[14].mxu1 }
 0x222   :  { %v486_v44 = vpack.c.bf16 %v750_v43, %v749_v41  ;;  %v467_v45 = vpop.f32.mrb[15].mxu1  ;;  %762 = vmatpush3.bf16.msra.mxu0 %v484_v38  ;;  %796 = vmatpush3.bf16.msra.mxu1 %v484_v38 }
 0x223   :  { %v485_v46 = vpack.c.bf16 %v467_v45, %v464_v42 }
 0x225   :  { %763 = vmatprep.subr.bf16.mxu0 %v485_v46  ;;  %789 = vmatprep.subr.bf16.mxu1 %v485_v46 }
 0x226   :  { %764 = vmatpush3.bf16.msra.mxu0 %v485_v46  ;;  %797 = vmatpush3.bf16.msra.mxu1 %v485_v46 }
 0x227   :  { %765 = vmatprep.subr.bf16.mxu0 %v486_v44  ;;  %790 = vmatprep.subr.bf16.mxu1 %v486_v44 }
 0x22a   :  { %766 = vmatpush3.bf16.msra.mxu0 %v486_v44  ;;  %798 = vmatpush3.bf16.msra.mxu1 %v486_v44 }
 0x22d   :  { %768 = vmatmul.mubr.bf16.vlgmr.msra.gmra.mrb[16].mxu0 %v985_v14  ;;  %776 = vmatmul.mubr.bf16.vlgmr.msra.gmra.mrb[16].mxu1 %v997_v19 }
 0x22e   :  { %771 = vmatprep.mubr.bf16.mxu0 %v987_v15  ;;  %779 = vmatprep.mubr.bf16.mxu1 %v999_v20 }
 0x235   :  { %772 = vmatmul.mubr.bf16.gmra.mrb[20].mxu0 %v991_v17  ;;  %780 = vmatmul.mubr.bf16.gmra.mrb[20].mxu1 %v1003_v21 }
 0x300   :  { %v769_v48 = vpop.f32.mrb[16].mxu0  ;;  %v777_v49 = vpop.f32.mrb[16].mxu1 }
 0x301   :  { %v537_v50 = vadd.f32 %v769_v48, %v638_v47  ;;  %v569_v51 = vadd.f32 %v777_v49, %v638_v47  ;;  %v528_v52 = vpop.f32.mrb[17].mxu0  ;;  %v560_v14 = vpop.f32.mrb[17].mxu1 }
 0x302   :  { %v529_v53 = vadd.f32 %v638_v47, %v528_v52  ;;  %v561_v19 = vadd.f32 %v638_v47, %v560_v14  ;;  %v770_v54 = vpop.f32.mrb[18].mxu0  ;;  %v778_v15 = vpop.f32.mrb[18].mxu1 }
 0x303   :  { %593 = vst [vmem:[%s1072_s5 + $0x10] sm:$0xff] %v537_v50  ;;  %601 = vst [vmem:[%s1072_s5 + $0x50] sm:$0xff] %v569_v51  ;;  %v540_v17 = vadd.f32 %v770_v54, %v638_v47  ;;  %v572_v20 = vadd.f32 %v778_v15, %v638_v47  ;;  %v531_v21 = vpop.f32.mrb[19].mxu0  ;;  %v563_v55 = vpop.f32.mrb[19].mxu1 }
 0x304   :  { %591 = vst [vmem:[%s1072_s5] sm:$0xff] %v529_v53  ;;  %599 = vst [vmem:[%s1072_s5 + $0x40] sm:$0xff] %v561_v19  ;;  %v532_v56 = vadd.f32 %v638_v47, %v531_v21  ;;  %v564_v57 = vadd.f32 %v638_v47, %v563_v55 }
 0x305   :  { %594 = vst [vmem:[%s1072_s5 + $0x18] sm:$0xff] %v540_v17  ;;  %602 = vst [vmem:[%s1072_s5 + $0x58] sm:$0xff] %v572_v20 }
 0x306   :  { %592 = vst [vmem:[%s1072_s5 + $0x8] sm:$0xff] %v532_v56  ;;  %600 = vst [vmem:[%s1072_s5 + $0x48] sm:$0xff] %v564_v57 }
 0x308   :  { %v773_v58 = vpop.f32.mrb[20].mxu0  ;;  %v781_v59 = vpop.f32.mrb[20].mxu1 }
 0x309   :  { %v553_v60 = vadd.f32 %v773_v58, %v638_v47  ;;  %v585_v61 = vadd.f32 %v781_v59, %v638_v47  ;;  %v544_v62 = vpop.f32.mrb[21].mxu0  ;;  %v576_v63 = vpop.f32.mrb[21].mxu1 }
 0x30a   :  { %v545_v0 = vadd.f32 %v638_v47, %v544_v62  ;;  %v577_v1 = vadd.f32 %v638_v47, %v576_v63  ;;  %v774_v2 = vpop.f32.mrb[22].mxu0  ;;  %v782_v3 = vpop.f32.mrb[22].mxu1 }
 0x30b   :  { %597 = vst [vmem:[%s1072_s5 + $0x30] sm:$0xff] %v553_v60  ;;  %605 = vst [vmem:[%s1072_s5 + $0x70] sm:$0xff] %v585_v61  ;;  %v556_v4 = vadd.f32 %v774_v2, %v638_v47  ;;  %v588_v5 = vadd.f32 %v782_v3, %v638_v47  ;;  %v547_v6 = vpop.f32.mrb[23].mxu0  ;;  %v579_v7 = vpop.f32.mrb[23].mxu1 }
 0x30c   :  { %595 = vst [vmem:[%s1072_s5 + $0x20] sm:$0xff] %v545_v0  ;;  %603 = vst [vmem:[%s1072_s5 + $0x60] sm:$0xff] %v577_v1  ;;  %v548_v8 = vadd.f32 %v638_v47, %v547_v6  ;;  %v580_v9 = vadd.f32 %v638_v47, %v579_v7 }
 0x30d   :  { %598 = vst [vmem:[%s1072_s5 + $0x38] sm:$0xff] %v556_v4  ;;  %606 = vst [vmem:[%s1072_s5 + $0x78] sm:$0xff] %v588_v5 }
 0x30e   :  { %596 = vst [vmem:[%s1072_s5 + $0x28] sm:$0xff] %v548_v8  ;;  %604 = vst [vmem:[%s1072_s5 + $0x68] sm:$0xff] %v580_v9 }
 0x30f   :  { %611 = vsyncpa [#allocation3], 1 }
 0x310   :  { %612 = vsyncpa [#allocation5], 1 }

</bundles_post_ra>
